<compile_context>
chip_gen: v7x
topology: tpu7x:2x2x1
jax: 0.10.0
libtpu: 0.0.40
codegen_flags: <defaults>
</compile_context>

<pallas_src>
import functools

import jax
import jax.numpy as jnp
import numpy as np
from jax.experimental import pallas as pl
from jax.experimental.pallas import tpu as pltpu

BN_EPS = 1e-5


def _round_up(x, m):
    return ((x + m - 1) // m) * m


def _pick_tiling(m_rows):
    """Generation-aware row-tile size and scoped VMEM limit."""
    try:
        vmem = int(pltpu.get_tpu_info().vmem_capacity_bytes)
    except Exception:  # conservative fallback (works on all generations)
        vmem = 64 * 1024 * 1024
    if vmem >= 100 * 1024 * 1024:            # v5e / v6e: 128 MiB physical VMEM
        tm_target, vmem_limit = 2048, 96 * 1024 * 1024
    else:                                     # v7x: 64 MiB physical VMEM
        tm_target, vmem_limit = 1024, 48 * 1024 * 1024
    tm = min(tm_target, _round_up(m_rows, 16))   # multiple of 16 (bf16 packing)
    return tm, vmem_limit


def _downsample_kernel(p_ref, w_ref, o_ref, stats_ref, *, tm, m_actual):
    # p_ref:     (tm, K)       bf16 patch tile
    # w_ref:     (K, C_pad)    bf16 conv weight (flattened, transposed, C-padded)
    # o_ref:     (tm, C_pad)   bf16 unnormalized conv output tile
    # stats_ref: (1, 2, C_pad) f32 per-tile [channel sum ; centered M2]
    m = pl.program_id(0)

    # Conv as one MXU matmul (bf16 operands, f32 accumulation).
    y = jnp.dot(p_ref[...], w_ref[...], preferred_element_type=jnp.float32)

    # Per-tile BN partial statistics; rows beyond the true M are masked out so
    # padded rows never contribute.  (VPU/XLU work sits in slack: mem-bound op.)
    row0 = m * tm
    row_ids = jax.lax.broadcasted_iota(jnp.int32, y.shape, 0) + row0
    valid = row_ids < m_actual
    n_valid = jnp.minimum(tm, m_actual - row0).astype(jnp.float32)   # >= 1

    y_masked = jnp.where(valid, y, 0.0)
    s = jnp.sum(y_masked, axis=0, keepdims=True)          # (1, C_pad)
    tile_mean = s / n_valid
    d = jnp.where(valid, y - tile_mean, 0.0)
    m2 = jnp.sum(d * d, axis=0, keepdims=True)             # (1, C_pad)

    stats_ref[...] = jnp.concatenate([s, m2], axis=0)[None]
    o_ref[...] = y.astype(o_ref.dtype)


@jax.jit
def downsample_d(x, conv_w, gamma, beta):
    """x: (N, C_in, H, W) f32.  conv_w: (C_out, C_in, 2, 2).  Returns NCHW f32."""
    N, C_in, H, W = x.shape
    C_out = conv_w.shape[0]
    Ho, Wo = H // 2, W // 2
    M = N * Ho * Wo
    K = C_in * 4

    # space-to-depth: (N, C, H, W) -> (M, K), column order (c, kh, kw) matching
    # PyTorch's flattened conv weight (C_out, C_in, 2, 2).
    # TODO(synk): fuse this gather (and the final NCHW transpose) into the kernel
    # via strided index_map / 4-tap decomposition to drop the extra HBM passes.
    patches = (
        x.reshape(N, C_in, Ho, 2, Wo, 2)
        .transpose(0, 2, 4, 1, 3, 5)
        .reshape(M, K)
    )

    tm, vmem_limit = _pick_tiling(M)
    M_pad = _round_up(M, tm)
    nm = M_pad // tm
    C_pad = _round_up(C_out, 128)              # lane-dense output stores

    # Only M is padded (zeros); K stays at its true extent in HBM.
    patches_p = jnp.pad(patches.astype(jnp.bfloat16), ((0, M_pad - M), (0, 0)))
    w_p = jnp.pad(conv_w.reshape(C_out, K).T.astype(jnp.bfloat16),
                  ((0, 0), (0, C_pad - C_out)))            # (K, C_pad)

    kernel = functools.partial(_downsample_kernel, tm=tm, m_actual=M)

    cost = pl.CostEstimate(
        flops=2 * M_pad * K * C_pad,                       # single matmul pass
        transcendentals=0,
        bytes_accessed=(M_pad * K * 2                      # patches (bf16), read once
                        + K * C_pad * 2                    # weights (bf16)
                        + M_pad * C_pad * 2                # bf16 output write
                        + nm * 2 * C_pad * 4),             # per-tile stats
    )

    y_flat, stats = pl.pallas_call(
        kernel,
        out_shape=(jax.ShapeDtypeStruct((M_pad, C_pad), jnp.bfloat16),
                   jax.ShapeDtypeStruct((nm, 2, C_pad), jnp.float32)),
        grid_spec=pltpu.PrefetchScalarGridSpec(
            num_scalar_prefetch=0,
            grid=(nm,),
            in_specs=[
                pl.BlockSpec((tm, K), lambda m: (m, 0)),
                # Grid-invariant weight block; only K*C_pad*2 (~4 KiB here), so
                # default double-buffering wastes negligible VMEM.
                pl.BlockSpec((K, C_pad), lambda m: (0, 0)),
            ],
            out_specs=(
                pl.BlockSpec((tm, C_pad), lambda m: (m, 0)),
                pl.BlockSpec((1, 2, C_pad), lambda m: (m, 0, 0)),
            ),
        ),
        compiler_params=pltpu.CompilerParams(
            # No cross-tile state: M axis is parallel (uses both TCs on v7x).
            dimension_semantics=("parallel",),
            vmem_limit_bytes=vmem_limit,
        ),
        cost_estimate=cost,
    )(patches_p, w_p)

    # ---- BN stats: Chan-style combine of per-tile (sum, centered M2), f32. ----
    sums = stats[:, 0, :C_out]                              # (nm, C_out)
    m2s = stats[:, 1, :C_out]
    counts = jnp.asarray(np.minimum(tm, M - np.arange(nm) * tm),
                         jnp.float32)[:, None]              # (nm, 1), all >= 1
    mean = jnp.sum(sums, axis=0) / M                        # (C_out,)
    tile_mean = sums / counts
    m2_total = jnp.sum(m2s, axis=0) + jnp.sum(counts * (tile_mean - mean) ** 2,
                                              axis=0)
    var = m2_total / M                                      # biased var (BN norm)
    scale = gamma.astype(jnp.float32) * jax.lax.rsqrt(var + BN_EPS)
    shift = beta.astype(jnp.float32) - mean * scale

    # Folded BN affine + unpad + (N,Ho,Wo,C)->NCHW; XLA fuses into one epilogue.
    out = y_flat[:M, :C_out].astype(jnp.float32) * scale + shift
    return out.reshape(N, Ho, Wo, C_out).transpose(0, 3, 1, 2)


def _reference(x, conv_w, gamma, beta):
    """Pure-JAX reference: lax conv + training-mode batch norm (f32)."""
    y = jax.lax.conv_general_dilated(
        x, conv_w, window_strides=(2, 2), padding="VALID",
        dimension_numbers=("NCHW", "OIHW", "NCHW"),
    )
    mean = jnp.mean(y, axis=(0, 2, 3), keepdims=True)
    var = jnp.mean((y - mean) ** 2, axis=(0, 2, 3), keepdims=True)
    g = gamma.reshape(1, -1, 1, 1)
    b = beta.reshape(1, -1, 1, 1)
    return (y - mean) * jax.lax.rsqrt(var + BN_EPS) * g + b


if __name__ == "__main__":
    key = jax.random.PRNGKey(0)
    k_x, k_w = jax.random.split(key)

    N, C_in, H, W = 2, 4, 16, 16
    C_out, stride = 8, 2

    x = jax.random.normal(k_x, (N, C_in, H, W), dtype=jnp.float32)
    # Deterministic synthetic conv weight (shape matches nn.Conv2d(nIn, nOut, 2)).
    fan_in = C_in * 2 * 2
    conv_w = jax.random.uniform(
        k_w, (C_out, C_in, 2, 2), dtype=jnp.float32,
        minval=-1.0 / np.sqrt(fan_in), maxval=1.0 / np.sqrt(fan_in),
    )
    # BatchNorm2d default parameter init: weight=1, bias=0.
    gamma = jnp.ones((C_out,), dtype=jnp.float32)
    beta = jnp.zeros((C_out,), dtype=jnp.float32)

    out = downsample_d(x, conv_w, gamma, beta)
    out = jax.block_until_ready(out)

    ref = jax.block_until_ready(_reference(x, conv_w, gamma, beta))
    # bf16 matmul operands / bf16 pre-affine store => loosened tolerance vs f32 ref.
    np.testing.assert_allclose(np.asarray(out), np.asarray(ref),
                               rtol=5e-2, atol=5e-2)

    assert out.shape == (N, C_out, H // 2, W // 2)
    print("KERNEL_OK")
</pallas_src>

<mosaic_0001>
module attributes {stable_mosaic.version = 11 : i64} {
  func.func @_downsample_kernel(%arg0: i32, %arg1: memref<128x16xbf16, #tpu.memory_space<vmem>>, %arg2: memref<16x128xbf16, #tpu.memory_space<vmem>>, %arg3: memref<128x128xbf16, #tpu.memory_space<vmem>>, %arg4: memref<1x2x128xf32, #tpu.memory_space<vmem>>) attributes {dimension_semantics = [#tpu.dimension_semantics<parallel>], iteration_bounds = array<i64: 1>, scalar_prefetch = 0 : i64, scratch_operands = 0 : i64, tpu.core_type = #tpu.core_type<tc>, window_params = [{transform_indices = @transform_0, window_bounds = array<i64: 128, 16>}, {pipeline_mode = #tpu.pipeline_mode<synchronous>, transform_indices = @transform_1, window_bounds = array<i64: 16, 128>}, {transform_indices = @transform_2, window_bounds = array<i64: 128, 128>}, {transform_indices = @transform_3, window_bounds = array<i64: 1, 2, 128>}]} {
    %c0 = arith.constant 0 : index
    %c0_0 = arith.constant 0 : index
    %0 = vector.load %arg1[%c0, %c0_0] : memref<128x16xbf16, #tpu.memory_space<vmem>>, vector<128x16xbf16>
    %c0_1 = arith.constant 0 : index
    %c0_2 = arith.constant 0 : index
    %1 = vector.load %arg2[%c0_1, %c0_2] : memref<16x128xbf16, #tpu.memory_space<vmem>>, vector<16x128xbf16>
    %cst = arith.constant dense<0.000000e+00> : vector<128x128xf32>
    %2 = tpu.matmul %0, %1, %cst {dimension_numbers = #tpu.dot_dimension_numbers<[1], [0], [0], [1], [0, 0, 1, 1], [], []>} : vector<128x16xbf16>, vector<16x128xbf16>, vector<128x128xf32> -> vector<128x128xf32>
    %c128_i32 = arith.constant 128 : i32
    %3 = arith.muli %arg0, %c128_i32 : i32
    %4 = tpu.iota {dimensions = array<i32: 0>} : vector<128x128xi32>
    %5 = vector.broadcast %3 : i32 to vector<128x128xi32>
    %6 = arith.addi %4, %5 : vector<128x128xi32>
    %c128_i32_3 = arith.constant 128 : i32
    %7 = vector.broadcast %c128_i32_3 : i32 to vector<128x128xi32>
    %8 = arith.cmpi slt, %6, %7 : vector<128x128xi32>
    %c128_i32_4 = arith.constant 128 : i32
    %9 = arith.subi %c128_i32_4, %3 : i32
    %c128_i32_5 = arith.constant 128 : i32
    %10 = arith.minsi %c128_i32_5, %9 : i32
    %11 = arith.sitofp %10 : i32 to f32
    %cst_6 = arith.constant 0.000000e+00 : f32
    %12 = vector.broadcast %cst_6 : f32 to vector<128x128xf32>
    %13 = arith.select %8, %2, %12 : vector<128x128xi1>, vector<128x128xf32>
    %cst_7 = arith.constant dense<0.000000e+00> : vector<128xf32>
    %14 = vector.multi_reduction <add>, %13, %cst_7 [0] : vector<128x128xf32> to vector<128xf32>
    %15 = vector.shape_cast %14 : vector<128xf32> to vector<1x128xf32>
    %16 = vector.broadcast %11 : f32 to vector<1x128xf32>
    %17 = arith.divf %15, %16 : vector<1x128xf32>
    %18 = vector.broadcast %17 : vector<1x128xf32> to vector<128x128xf32>
    %19 = arith.subf %2, %18 : vector<128x128xf32>
    %cst_8 = arith.constant 0.000000e+00 : f32
    %20 = vector.broadcast %cst_8 : f32 to vector<128x128xf32>
    %21 = arith.select %8, %19, %20 : vector<128x128xi1>, vector<128x128xf32>
    %22 = arith.mulf %21, %21 : vector<128x128xf32>
    %cst_9 = arith.constant dense<0.000000e+00> : vector<128xf32>
    %23 = vector.multi_reduction <add>, %22, %cst_9 [0] : vector<128x128xf32> to vector<128xf32>
    %24 = vector.shape_cast %23 : vector<128xf32> to vector<1x128xf32>
    %25 = tpu.concatenate %15, %24 in 0 : vector<1x128xf32>, vector<1x128xf32> -> vector<2x128xf32>
    %26 = vector.shape_cast %25 : vector<2x128xf32> to vector<1x2x128xf32>
    %c0_10 = arith.constant 0 : index
    %c0_11 = arith.constant 0 : index
    %c0_12 = arith.constant 0 : index
    %27 = vector.load %arg4[%c0_10, %c0_11, %c0_12] : memref<1x2x128xf32, #tpu.memory_space<vmem>>, vector<1x2x128xf32>
    tpu.vector_store %arg4[%c0_10, %c0_11, %c0_12], %26 {strides = array<i32>} : memref<1x2x128xf32, #tpu.memory_space<vmem>>, vector<1x2x128xf32>,
    %28 = arith.truncf %2 : vector<128x128xf32> to vector<128x128xbf16>
    %c0_13 = arith.constant 0 : index
    %c0_14 = arith.constant 0 : index
    %29 = vector.load %arg3[%c0_13, %c0_14] : memref<128x128xbf16, #tpu.memory_space<vmem>>, vector<128x128xbf16>
    tpu.vector_store %arg3[%c0_13, %c0_14], %28 {strides = array<i32>} : memref<128x128xbf16, #tpu.memory_space<vmem>>, vector<128x128xbf16>,
    return
  }
  func.func @transform_0(%arg0: i32) -> (i32, i32) {
    %c0_i32 = arith.constant 0 : i32
    %c0_i32_0 = arith.constant 0 : i32
    return %arg0, %c0_i32 : i32, i32
  }
  func.func @transform_1(%arg0: i32) -> (i32, i32) {
    %c0_i32 = arith.constant 0 : i32
    %c0_i32_0 = arith.constant 0 : i32
    %c0_i32_1 = arith.constant 0 : i32
    return %c0_i32, %c0_i32_0 : i32, i32
  }
  func.func @transform_2(%arg0: i32) -> (i32, i32) {
    %c0_i32 = arith.constant 0 : i32
    %c0_i32_0 = arith.constant 0 : i32
    return %arg0, %c0_i32 : i32, i32
  }
  func.func @transform_3(%arg0: i32) -> (i32, i32, i32) {
    %c0_i32 = arith.constant 0 : i32
    %c0_i32_0 = arith.constant 0 : i32
    %c0_i32_1 = arith.constant 0 : i32
    return %arg0, %c0_i32, %c0_i32_0 : i32, i32, i32
  }
}

</mosaic_0001>

<bundles_post_ra>
// kernel: downsample_d.1
= control target key start
LH: loop header
LB: loop body
LE: loop exit
PB: predicated region body
PF: predicated region fallthrough
CT: control target
= control target key end

     0   :  { %vm78_vm0 = vcmask 130048   ;;  %vm364_vm1 = vcmask 1040384   ;;  %s671_s1 = inlined_call_operand.vmem [shape: bf16[16,128], index: 1, kind: input, shape index: {}]   ;;  %s672_s0 = inlined_call_operand.vmem [shape: bf16[128,16], index: 0, kind: input, shape index: {}]   ;;  %s673_s2 = inlined_call_operand.vmem [shape: bf16[128,128], index: 2, kind: output, shape index: {0}]   ;;  %s674_s3 = inlined_call_operand.vmem [shape: f32[1,2,128], index: 3, kind: output, shape index: {1}]  }
   0x1   :  { %v580_v0 = vld [vmem:[%s671_s1] sm:$0xff]   ;;  %v582_v2 = vld [vmem:[%s672_s0 + $0x8] sm:$0xff]   ;;  %v583_v3 = vld [vmem:[%s672_s0 + $0x10] sm:$0xff]  }
   0x2   :  { %v581_v1 = vld [vmem:[%s672_s0] sm:$0xff]   ;;  %560 = vmatprep.subr.bf16.mxu0 %v580_v0  ;;  %578 = vmatprep.subr.bf16.mxu1 %v580_v0  ;;  %v586_v5 = vld [vmem:[%s672_s0 + $0x28] sm:$0xff]   ;;  %v587_v6 = vld [vmem:[%s672_s0 + $0x30] sm:$0xff]  }
   0x3   :  { %561 = vmatpush3.bf16.msra.mxu0 %v580_v0  ;;  %562 = vmatprep.mubr.msk.bf16.mxu0 %vm78_vm0, %v581_v1  ;;  %v585_v4 = vld [vmem:[%s672_s0 + $0x20] sm:$0xff]   ;;  %v584_v7 = vld [vmem:[%s672_s0 + $0x18] sm:$0xff]  }
   0x4   :  { %579 = vmatpush3.bf16.msra.mxu1 %v580_v0  ;;  %570 = vmatprep.mubr.msk.bf16.mxu1 %vm78_vm0, %v585_v4  ;;  %v588_v8 = vld [vmem:[%s672_s0 + $0x38] sm:$0xff]  }
   0x6   :  { %563 = vmatmul.mubr.msk.bf16.vlgmr.msra.gmra.mrb[0].mxu0 %vm78_vm0, %v582_v2 }
   0x7   :  { %566 = vmatprep.mubr.msk.bf16.mxu0 %vm78_vm0, %v583_v3  ;;  %571 = vmatmul.mubr.msk.bf16.vlgmr.msra.gmra.mrb[0].mxu1 %vm78_vm0, %v586_v5 }
   0x8   :  { %574 = vmatprep.mubr.msk.bf16.mxu1 %vm78_vm0, %v587_v6 }
   0xe   :  { %567 = vmatmul.mubr.msk.bf16.gmra.mrb[4].mxu0 %vm78_vm0, %v584_v7 }
   0xf   :  { %575 = vmatmul.mubr.msk.bf16.gmra.mrb[4].mxu1 %vm78_vm0, %v588_v8 }
  0xd9   :  { %v564_v9 = vpop.f32.mrb[0].mxu0 }
  0xda   :  { %v137_v10 = vpop.f32.mrb[1].mxu0  ;;  %v572_v12 = vpop.f32.mrb[0].mxu1 }
  0xdb   :  { %v565_v11 = vpop.f32.mrb[2].mxu0  ;;  %v169_v15 = vpop.f32.mrb[1].mxu1 }
  0xdc   :  { %v512_v13 = vpack.c.bf16 %v565_v11, %v564_v9  ;;  %v140_v14 = vpop.f32.mrb[3].mxu0  ;;  %v573_v18 = vpop.f32.mrb[2].mxu1 }
  0xdd   :  { %v271_v16 = vadd.f32 %v140_v14, %v137_v10  ;;  %v507_v17 = vpack.c.bf16 %v140_v14, %v137_v10  ;;  %v532_v19 = vpack.c.bf16 %v573_v18, %v572_v12  ;;  %v172_v20 = vpop.f32.mrb[3].mxu1 }
  0xde   :  { %544 = vst [vmem:[%s673_s2 + $0x8] sm:$0xff] %v512_v13   ;;  %v527_v22 = vpack.c.bf16 %v172_v20, %v169_v15 }
  0xdf   :  { %v272_v21 = vadd.f32 %v564_v9, %v271_v16  ;;  %508 = vst [vmem:[%s673_s2] sm:$0xff] %v507_v17   ;;  %548 = vst [vmem:[%s673_s2 + $0x28] sm:$0xff] %v532_v19  }
  0xe0   :  { %547 = vst [vmem:[%s673_s2 + $0x20] sm:$0xff] %v527_v22  }
  0xe1   :  { %v568_v23 = vpop.f32.mrb[4].mxu0  ;;  %v273_v24 = vadd.f32 %v565_v11, %v272_v21 }
  0xe2   :  { %v153_v25 = vpop.f32.mrb[5].mxu0  ;;  %v576_v28 = vpop.f32.mrb[4].mxu1 }
  0xe3   :  { %v274_v26 = vadd.f32 %v273_v24, %v153_v25  ;;  %v569_v27 = vpop.f32.mrb[6].mxu0  ;;  %v185_v31 = vpop.f32.mrb[5].mxu1 }
  0xe4   :  { %v522_v29 = vpack.c.bf16 %v569_v27, %v568_v23  ;;  %v156_v30 = vpop.f32.mrb[7].mxu0  ;;  %v577_v34 = vpop.f32.mrb[6].mxu1 }
  0xe5   :  { %v275_v32 = vadd.f32 %v274_v26, %v156_v30  ;;  %v517_v33 = vpack.c.bf16 %v156_v30, %v153_v25  ;;  %v542_v35 = vpack.c.bf16 %v577_v34, %v576_v28  ;;  %v188_v36 = vpop.f32.mrb[7].mxu1 }
  0xe6   :  { %546 = vst [vmem:[%s673_s2 + $0x18] sm:$0xff] %v522_v29   ;;  %v537_v38 = vpack.c.bf16 %v188_v36, %v185_v31 }
  0xe7   :  { %v276_v37 = vadd.f32 %v568_v23, %v275_v32  ;;  %545 = vst [vmem:[%s673_s2 + $0x10] sm:$0xff] %v517_v33   ;;  %550 = vst [vmem:[%s673_s2 + $0x38] sm:$0xff] %v542_v35  }
  0xe8   :  { %549 = vst [vmem:[%s673_s2 + $0x30] sm:$0xff] %v537_v38  }
  0xe9   :  { %v277_v39 = vadd.f32 %v569_v27, %v276_v37 }
  0xeb   :  { %v278_v40 = vadd.f32 %v277_v39, %v169_v15 }
  0xed   :  { %v279_v41 = vadd.f32 %v278_v40, %v172_v20 }
  0xef   :  { %v280_v42 = vadd.f32 %v572_v12, %v279_v41 }
  0xf1   :  { %v281_v43 = vadd.f32 %v573_v18, %v280_v42 }
  0xf3   :  { %v282_v44 = vadd.f32 %v281_v43, %v185_v31 }
  0xf5   :  { %v283_v45 = vadd.f32 %v282_v44, %v188_v36 }
  0xf7   :  { %v284_v46 = vadd.f32 %v576_v28, %v283_v45 }
  0xf9   :  { %v285_v47 = vadd.f32 %v577_v34, %v284_v46 }
  0xfb   :  { %v286_v48 = vrot.slane %v285_v47, 4 }
  0xfd   :  { %v287_v49 = vadd.f32 %v286_v48, %v285_v47 }
  0xff   :  { %v288_v50 = vrot.slane %v287_v49, 2 }
 0x101   :  { %v289_v51 = vadd.f32 %v288_v50, %v287_v49 }
 0x103   :  { %v290_v52 = vrot.slane %v289_v51, 1 }
 0x105   :  { %v291_v53 = vadd.f32 %v290_v52, %v289_v51 }
 0x107   :  { %v294_v54 = vmul.f32 0.0078125, %v291_v53 }
 0x109   :  { %v295_v55 = vsub.f32 %v137_v10, %v294_v54  ;;  %v296_v56 = vsub.f32 %v140_v14, %v294_v54  ;;  %v297_v57 = vsub.f32 %v564_v9, %v294_v54  ;;  %v298_v58 = vsub.f32 %v565_v11, %v294_v54 }
 0x10a   :  { %v299_v59 = vsub.f32 %v153_v25, %v294_v54  ;;  %v300_v60 = vsub.f32 %v156_v30, %v294_v54  ;;  %v301_v61 = vsub.f32 %v568_v23, %v294_v54  ;;  %v302_v62 = vsub.f32 %v569_v27, %v294_v54 }
 0x10b   :  { %v303_v63 = vsub.f32 %v169_v15, %v294_v54  ;;  %v304_v0 = vsub.f32 %v172_v20, %v294_v54  ;;  %v305_v1 = vsub.f32 %v572_v12, %v294_v54  ;;  %v306_v2 = vsub.f32 %v573_v18, %v294_v54 }
 0x10c   :  { %v307_v3 = vsub.f32 %v185_v31, %v294_v54  ;;  %v308_v4 = vsub.f32 %v188_v36, %v294_v54  ;;  %v309_v5 = vsub.f32 %v576_v28, %v294_v54  ;;  %v310_v6 = vsub.f32 %v577_v34, %v294_v54 }
 0x10d   :  { %v327_v7 = vmul.f32 %v295_v55, %v295_v55  ;;  %v328_v8 = vmul.f32 %v296_v56, %v296_v56  ;;  %v329_v13 = vmul.f32 %v297_v57, %v297_v57  ;;  %v330_v10 = vmul.f32 %v298_v58, %v298_v58 }
 0x10e   :  { %v331_v9 = vmul.f32 %v299_v59, %v299_v59  ;;  %v332_v17 = vmul.f32 %v300_v60, %v300_v60  ;;  %v333_v21 = vmul.f32 %v301_v61, %v301_v61  ;;  %v334_v15 = vmul.f32 %v302_v62, %v302_v62 }
 0x10f   :  { %v343_v16 = vadd.f32 %v328_v8, %v327_v7  ;;  %v335_v12 = vmul.f32 %v303_v63, %v303_v63  ;;  %v336_v23 = vmul.f32 %v304_v0, %v304_v0  ;;  %v337_v25 = vmul.f32 %v305_v1, %v305_v1 }
 0x110   :  { %v338_v27 = vmul.f32 %v306_v2, %v306_v2  ;;  %v339_v29 = vmul.f32 %v307_v3, %v307_v3  ;;  %v340_v31 = vmul.f32 %v308_v4, %v308_v4  ;;  %v341_v33 = vmul.f32 %v309_v5, %v309_v5 }
 0x111   :  { %v344_v14 = vadd.f32 %v343_v16, %v329_v13  ;;  %v342_v35 = vmul.f32 %v310_v6, %v310_v6 }
 0x113   :  { %v345_v11 = vadd.f32 %v344_v14, %v330_v10 }
 0x115   :  { %v346_v19 = vadd.f32 %v345_v11, %v331_v9 }
 0x117   :  { %v347_v22 = vadd.f32 %v346_v19, %v332_v17 }
 0x119   :  { %v348_v20 = vadd.f32 %v347_v22, %v333_v21 }
 0x11b   :  { %v349_v18 = vadd.f32 %v348_v20, %v334_v15 }
 0x11d   :  { %v350_v24 = vadd.f32 %v349_v18, %v335_v12 }
 0x11f   :  { %v351_v26 = vadd.f32 %v350_v24, %v336_v23 }
 0x121   :  { %v352_v28 = vadd.f32 %v351_v26, %v337_v25 }
 0x123   :  { %v353_v30 = vadd.f32 %v352_v28, %v338_v27 }
 0x125   :  { %v354_v32 = vadd.f32 %v353_v30, %v339_v29 }
 0x127   :  { %v355_v34 = vadd.f32 %v354_v32, %v340_v31 }
 0x129   :  { %v356_v36 = vadd.f32 %v355_v34, %v341_v33 }
 0x12b   :  { %v357_v37 = vadd.f32 %v356_v36, %v342_v35 }
 0x12d   :  { %v358_v38 = vrot.slane %v357_v37, 4 }
 0x12f   :  { %v359_v39 = vadd.f32 %v358_v38, %v357_v37 }
 0x131   :  { %v360_v40 = vrot.slane %v359_v39, 2 }
 0x133   :  { %v361_v41 = vadd.f32 %v360_v40, %v359_v39 }
 0x135   :  { %v362_v42 = vrot.slane %v361_v41, 1 }
 0x137   :  { %v363_v43 = vadd.f32 %v362_v42, %v361_v41 }
 0x139   :  { %v365_v44 = vsel %vm364_vm1, %v291_v53, %v363_v43 }
 0x13a   :  { %366 = vst [vmem:[%s674_s3] sm:$0x3] %v365_v44 }

</bundles_post_ra>
